<compile_context>
chip_gen: v5e
topology: v5e:2x2
jax: 0.10.0
libtpu: 0.0.40
codegen_flags: <defaults>
</compile_context>

<pallas_src>
import jax
import jax.numpy as jnp
from jax.experimental import pallas as pl
from jax.experimental.pallas import tpu as pltpu


def _round_up(x, m):
    return (x + m - 1) // m * m


def _cdiv(a, b):
    return (a + b - 1) // b


# Conservative per-call VMEM budget (bytes). Fits under the default scoped
# limits of v5e (16 MiB) and v6e/v7x (32 MiB scoped; v7x 64 MiB physical).
_VMEM_BUDGET = 12 * 1024 * 1024
# Keep the (already transposed) weight grid-resident when it is at most this big.
_WEIGHT_RESIDENT_MAX = 8 * 1024 * 1024
_VMEM_LIMIT_BYTES = 32 * 1024 * 1024


# ----------------------------- kernels --------------------------------------

def _linear_resident_kernel(x_ref, wt_ref, b_ref, o_ref):
    # x_ref : (TB, F_pad)      flattened-input tile
    # wt_ref: (F_pad, C_pad)   pre-transposed weight, grid-resident (DMA'd once)
    # b_ref : (1, C_pad)       bias, grid-resident
    # o_ref : (TB, C_pad)      lane-dense logits tile
    o_ref[...] = b_ref[...] + jnp.dot(
        x_ref[...], wt_ref[...], preferred_element_type=jnp.float32)


def _linear_ktiled_kernel(x_ref, wt_ref, b_ref, o_ref):
    # Fallback when the classifier head is too large to keep resident.
    # x_ref : (TB, TK); wt_ref: (TK, C_pad); b_ref: (1, C_pad); o_ref: (TB, C_pad)
    k = pl.program_id(1)

    @pl.when(k == 0)
    def _():
        # Init the (f32, VMEM-resident) output block to the bias: removes both
        # the accumulator scratch and the finalize add.
        o_ref[...] = jnp.broadcast_to(b_ref[...], o_ref.shape)

    o_ref[...] += jnp.dot(
        x_ref[...], wt_ref[...], preferred_element_type=jnp.float32)


# ----------------------------- wrapper ---------------------------------------

@jax.jit
def psoftmax_model2_forward(x, weight, bias):
    """Equivalent of PSoftmaxModel2.forward.

    x:      [B, ...] float32 (trailing dims flattened like x.view(B, -1))
    weight: [cate_num, fea_num] float32 (PyTorch nn.Linear layout)
    bias:   [cate_num] float32
    returns [B, cate_num] float32 logits (no softmax, matching the module)
    """
    B = x.shape[0]
    fea_num = 1
    for d in x.shape[1:]:
        fea_num *= d
    cate_num = weight.shape[0]

    # ---- FlattenLayer (glue, plain JAX) ----
    x_flat = x.reshape(B, fea_num).astype(jnp.float32)

    C_pad = _round_up(max(cate_num, 128), 128)     # lane-dense output width
    F_pad = _round_up(fea_num, 128)

    # x is padded along K only when fea_num is not lane-aligned (rare). The
    # batch dimension is never padded: the grid uses cdiv and out-of-bounds
    # rows are garbage that the final slice discards.
    # TODO(synk): mask the K tail in-kernel instead of this HBM pad pass.
    if F_pad != fea_num:
        x_flat = jnp.pad(x_flat, ((0, 0), (0, F_pad - fea_num)))

    # One-time weight prep: zero-pad and transpose to (F_pad, C_pad) so the
    # kernel contracts ((1,),(0,)) -- paid once, never per grid step.
    w = weight.astype(jnp.float32)
    if (cate_num, fea_num) != (C_pad, F_pad):
        w = jnp.pad(w, ((0, C_pad - cate_num), (0, F_pad - fea_num)))
    w_t = w.T                                                       # (F_pad, C_pad)
    b_pad = jnp.pad(bias.astype(jnp.float32), (0, C_pad - cate_num)).reshape(1, C_pad)

    # TODO(synk): bf16 operands (f32 accumulate) would halve HBM traffic on
    # v6e/v7x for this memory-bound GEMV; kept f32 to match the PyTorch module.

    weight_bytes = F_pad * C_pad * 4
    compiler_params = None  # set below

    if weight_bytes <= _WEIGHT_RESIDENT_MAX:
        # ------- resident-weight path: weight fetched exactly once -----------
        # VMEM: 2*TB*F_pad*4 (x, dbl-buffered) + 2*weight + 2*TB*C_pad*4 (out).
        avail = _VMEM_BUDGET - 2 * weight_bytes - 4 * C_pad
        tb_fit = avail // (8 * (F_pad + C_pad))
        TB = min(1024, _round_up(B, 8), max(8, (tb_fit // 8) * 8))
        # v7x megacore: prefer >= 2 batch tiles when the batch allows it.
        if B > 8 and _cdiv(B, TB) < 2:
            TB = max(8, _round_up(_cdiv(B, 2), 8))
        # TODO(synk): for tiny batches (B <= 8) on v7x one TensorCore idles;
        # a per-core K-split with partial-sum combine would recover it.

        out_padded = pl.pallas_call(
            _linear_resident_kernel,
            out_shape=jax.ShapeDtypeStruct((B, C_pad), jnp.float32),
            grid=(_cdiv(B, TB),),
            in_specs=[
                pl.BlockSpec((TB, F_pad), lambda i: (i, 0)),        # x tile
                pl.BlockSpec((F_pad, C_pad), lambda i: (0, 0)),     # weight (resident)
                pl.BlockSpec((1, C_pad), lambda i: (0, 0)),         # bias (resident)
            ],
            out_specs=pl.BlockSpec((TB, C_pad), lambda i: (i, 0)),
            compiler_params=pltpu.CompilerParams(
                dimension_semantics=("parallel",),
                vmem_limit_bytes=_VMEM_LIMIT_BYTES,
            ),
        )(x_flat, w_t, b_pad)
    else:
        # ------- K-tiled fallback for very large heads ------------------------
        # TODO(synk): also tile C_pad (extra parallel grid axis) once
        # C_pad * TK tiles approach the VMEM budget.
        tk_cap = max(128, min(2048, ((_VMEM_BUDGET // 2) // (8 * C_pad)) // 128 * 128))
        TK = 128
        for cand in range(tk_cap, 0, -128):     # largest 128-multiple dividing F_pad
            if F_pad % cand == 0:
                TK = cand
                break
        avail = _VMEM_BUDGET - 8 * TK * C_pad - 4 * C_pad
        tb_fit = avail // (8 * (TK + C_pad))
        TB = min(1024, _round_up(B, 8), max(8, (tb_fit // 8) * 8))
        if B > 8 and _cdiv(B, TB) < 2:
            TB = max(8, _round_up(_cdiv(B, 2), 8))

        out_padded = pl.pallas_call(
            _linear_ktiled_kernel,
            out_shape=jax.ShapeDtypeStruct((B, C_pad), jnp.float32),
            grid=(_cdiv(B, TB), F_pad // TK),
            in_specs=[
                pl.BlockSpec((TB, TK), lambda i, k: (i, k)),        # x tile
                pl.BlockSpec((TK, C_pad), lambda i, k: (k, 0)),     # weight tile
                pl.BlockSpec((1, C_pad), lambda i, k: (0, 0)),      # bias (resident)
            ],
            out_specs=pl.BlockSpec((TB, C_pad), lambda i, k: (i, 0)),
            compiler_params=pltpu.CompilerParams(
                dimension_semantics=("parallel", "arbitrary"),
                vmem_limit_bytes=_VMEM_LIMIT_BYTES,
            ),
        )(x_flat, w_t, b_pad)

    return out_padded[:, :cate_num]


if __name__ == "__main__":
    # Small shapes consistent with the module: x [2, 4, 16, 16] -> fea_num=1024
    B, C, H, W = 2, 4, 16, 16
    fea_num = C * H * W
    cate_num = 10

    key = jax.random.PRNGKey(0)
    kx, kw, kb = jax.random.split(key, 3)

    x = jax.random.normal(kx, (B, C, H, W), dtype=jnp.float32)
    # Deterministic parameter init (synthetic, mimicking nn.Linear's uniform range)
    bound = 1.0 / (fea_num ** 0.5)
    weight = jax.random.uniform(kw, (cate_num, fea_num), jnp.float32, -bound, bound)
    bias = jax.random.uniform(kb, (cate_num,), jnp.float32, -bound, bound)

    logits = psoftmax_model2_forward(x, weight, bias)
    jax.block_until_ready(logits)

    # Cross-check against plain-JAX reference of the same math.
    ref = x.reshape(B, -1) @ weight.T + bias
    assert logits.shape == (B, cate_num)
    assert jnp.allclose(logits, ref, atol=1e-4, rtol=1e-4)

    print("KERNEL_OK")
</pallas_src>

<mosaic_0001>
module attributes {stable_mosaic.version = 11 : i64} {
  func.func @_linear_resident_kernel(%arg0: i32, %arg1: memref<8x1024xf32, #tpu.memory_space<vmem>>, %arg2: memref<1024x128xf32, #tpu.memory_space<vmem>>, %arg3: memref<1x128xf32, #tpu.memory_space<vmem>>, %arg4: memref<8x128xf32, #tpu.memory_space<vmem>>) attributes {dimension_semantics = [#tpu.dimension_semantics<parallel>], iteration_bounds = array<i64: 1>, scalar_prefetch = 0 : i64, scratch_operands = 0 : i64, tpu.core_type = #tpu.core_type<tc>, window_params = [{transform_indices = @transform_0, window_bounds = array<i64: 8, 1024>}, {pipeline_mode = #tpu.pipeline_mode<synchronous>, transform_indices = @transform_1, window_bounds = array<i64: 1024, 128>}, {pipeline_mode = #tpu.pipeline_mode<synchronous>, transform_indices = @transform_2, window_bounds = array<i64: 1, 128>}, {transform_indices = @transform_3, window_bounds = array<i64: 8, 128>}]} {
    %c0 = arith.constant 0 : index
    %c0_0 = arith.constant 0 : index
    %0 = vector.load %arg3[%c0, %c0_0] : memref<1x128xf32, #tpu.memory_space<vmem>>, vector<1x128xf32>
    %c0_1 = arith.constant 0 : index
    %c0_2 = arith.constant 0 : index
    %1 = vector.load %arg1[%c0_1, %c0_2] : memref<8x1024xf32, #tpu.memory_space<vmem>>, vector<8x1024xf32>
    %c0_3 = arith.constant 0 : index
    %c0_4 = arith.constant 0 : index
    %2 = vector.load %arg2[%c0_3, %c0_4] : memref<1024x128xf32, #tpu.memory_space<vmem>>, vector<1024x128xf32>
    %cst = arith.constant dense<0.000000e+00> : vector<8x128xf32>
    %3 = tpu.matmul %1, %2, %cst {dimension_numbers = #tpu.dot_dimension_numbers<[1], [0], [0], [1], [0, 0, 1, 1], [], []>} : vector<8x1024xf32>, vector<1024x128xf32>, vector<8x128xf32> -> vector<8x128xf32>
    %4 = vector.broadcast %0 : vector<1x128xf32> to vector<8x128xf32>
    %5 = arith.addf %4, %3 : vector<8x128xf32>
    %c0_5 = arith.constant 0 : index
    %c0_6 = arith.constant 0 : index
    %6 = vector.load %arg4[%c0_5, %c0_6] : memref<8x128xf32, #tpu.memory_space<vmem>>, vector<8x128xf32>
    tpu.vector_store %arg4[%c0_5, %c0_6], %5 {strides = array<i32>} : memref<8x128xf32, #tpu.memory_space<vmem>>, vector<8x128xf32>,
    return
  }
  func.func @transform_0(%arg0: i32) -> (i32, i32) {
    %c0_i32 = arith.constant 0 : i32
    %c0_i32_0 = arith.constant 0 : i32
    return %arg0, %c0_i32 : i32, i32
  }
  func.func @transform_1(%arg0: i32) -> (i32, i32) {
    %c0_i32 = arith.constant 0 : i32
    %c0_i32_0 = arith.constant 0 : i32
    %c0_i32_1 = arith.constant 0 : i32
    return %c0_i32, %c0_i32_0 : i32, i32
  }
  func.func @transform_2(%arg0: i32) -> (i32, i32) {
    %c0_i32 = arith.constant 0 : i32
    %c0_i32_0 = arith.constant 0 : i32
    %c0_i32_1 = arith.constant 0 : i32
    return %c0_i32, %c0_i32_0 : i32, i32
  }
  func.func @transform_3(%arg0: i32) -> (i32, i32) {
    %c0_i32 = arith.constant 0 : i32
    %c0_i32_0 = arith.constant 0 : i32
    return %arg0, %c0_i32 : i32, i32
  }
}

</mosaic_0001>

<bundles_post_ra>
// kernel: psoftmax_model2_forward.1
= control target key start
LH: loop header
LB: loop body
LE: loop exit
PB: predicated region body
PF: predicated region fallthrough
CT: control target
= control target key end

     0   :  { %8 = vsyncpa [#allocation3], 0  ;;  %s841_s0 = inlined_call_operand.vmem [shape: f32[2,1024], index: 0, kind: input, shape index: {}]   ;;  %s842_s1 = inlined_call_operand.vmem [shape: f32[1024,128], index: 1, kind: input, shape index: {}]   ;;  %s843_s2 = inlined_call_operand.vmem [shape: f32[1,128], index: 2, kind: input, shape index: {}]   ;;  %s844_s3 = inlined_call_operand.hbm [shape: f32[2,128], index: 3, kind: output, shape index: {}]  }
   0x1   :  { %v39_v0 = vld [vmem:[%s842_s1 + $0x78] sm:$0xff]  ;;  %v38_v2 = vld [vmem:[%s842_s1 + $0x70] sm:$0xff]  ;;  %v37_v6 = vld [vmem:[%s842_s1 + $0x68] sm:$0xff] }
   0x2   :  { %v71_v1 = vld [vmem:[%s842_s1 + $0x178] sm:$0xff]  ;;  %191 = vmatpush.msra.mxu0 %v39_v0  ;;  %v70_v4 = vld [vmem:[%s842_s1 + $0x170] sm:$0xff]  ;;  %v69_v8 = vld [vmem:[%s842_s1 + $0x168] sm:$0xff] }
   0x3   :  { %231 = vmatpush.msra.mxu2 %v71_v1  ;;  %v55_v3 = vld [vmem:[%s842_s1 + $0xf8] sm:$0xff]  ;;  %v54_v7 = vld [vmem:[%s842_s1 + $0xf0] sm:$0xff]  ;;  %v36_v10 = vld [vmem:[%s842_s1 + $0x60] sm:$0xff] }
   0x4   :  { %211 = vmatpush.msra.mxu1 %v55_v3  ;;  %v87_v5 = vld [vmem:[%s842_s1 + $0x1f8] sm:$0xff]  ;;  %192 = vmatpush.msra.mxu0 %v38_v2  ;;  %v86_v9 = vld [vmem:[%s842_s1 + $0x1f0] sm:$0xff]  ;;  %v53_v11 = vld [vmem:[%s842_s1 + $0xe8] sm:$0xff] }
   0x5   :  { %232 = vmatpush.msra.mxu2 %v70_v4  ;;  %251 = vmatpush.msra.mxu3 %v87_v5  ;;  %v68_v12 = vld [vmem:[%s842_s1 + $0x160] sm:$0xff]  ;;  %v85_v13 = vld [vmem:[%s842_s1 + $0x1e8] sm:$0xff]  ;;  %v35_v15 = vld [vmem:[%s842_s1 + $0x58] sm:$0xff] }
   0x6   :  { %212 = vmatpush.msra.mxu1 %v54_v7  ;;  %193 = vmatpush.msra.mxu0 %v37_v6  ;;  %v52_v14 = vld [vmem:[%s842_s1 + $0xe0] sm:$0xff]  ;;  %v67_v16 = vld [vmem:[%s842_s1 + $0x158] sm:$0xff]  ;;  %v34_v19 = vld [vmem:[%s842_s1 + $0x50] sm:$0xff] }
   0x7   :  { %233 = vmatpush.msra.mxu2 %v69_v8  ;;  %252 = vmatpush.msra.mxu3 %v86_v9  ;;  %v84_v17 = vld [vmem:[%s842_s1 + $0x1e0] sm:$0xff]  ;;  %v51_v18 = vld [vmem:[%s842_s1 + $0xd8] sm:$0xff]  ;;  %v66_v20 = vld [vmem:[%s842_s1 + $0x150] sm:$0xff] }
   0x8   :  { %213 = vmatpush.msra.mxu1 %v53_v11  ;;  %194 = vmatpush.msra.mxu0 %v36_v10  ;;  %v83_v21 = vld [vmem:[%s842_s1 + $0x1d8] sm:$0xff]  ;;  %v50_v22 = vld [vmem:[%s842_s1 + $0xd0] sm:$0xff]  ;;  %v33_v23 = vld [vmem:[%s842_s1 + $0x48] sm:$0xff] }
   0x9   :  { %234 = vmatpush.msra.mxu2 %v68_v12  ;;  %253 = vmatpush.msra.mxu3 %v85_v13  ;;  %v65_v24 = vld [vmem:[%s842_s1 + $0x148] sm:$0xff]  ;;  %v82_v25 = vld [vmem:[%s842_s1 + $0x1d0] sm:$0xff]  ;;  %v32_v27 = vld [vmem:[%s842_s1 + $0x40] sm:$0xff] }
   0xa   :  { %214 = vmatpush.msra.mxu1 %v52_v14  ;;  %195 = vmatpush.msra.mxu0 %v35_v15  ;;  %v49_v26 = vld [vmem:[%s842_s1 + $0xc8] sm:$0xff]  ;;  %v64_v28 = vld [vmem:[%s842_s1 + $0x140] sm:$0xff]  ;;  %v31_v31 = vld [vmem:[%s842_s1 + $0x38] sm:$0xff] }
   0xb   :  { %235 = vmatpush.msra.mxu2 %v67_v16  ;;  %254 = vmatpush.msra.mxu3 %v84_v17  ;;  %v81_v29 = vld [vmem:[%s842_s1 + $0x1c8] sm:$0xff]  ;;  %v48_v30 = vld [vmem:[%s842_s1 + $0xc0] sm:$0xff]  ;;  %v63_v32 = vld [vmem:[%s842_s1 + $0x138] sm:$0xff] }
   0xc   :  { %215 = vmatpush.msra.mxu1 %v51_v18  ;;  %196 = vmatpush.msra.mxu0 %v34_v19  ;;  %v80_v33 = vld [vmem:[%s842_s1 + $0x1c0] sm:$0xff]  ;;  %v47_v34 = vld [vmem:[%s842_s1 + $0xb8] sm:$0xff]  ;;  %v30_v35 = vld [vmem:[%s842_s1 + $0x30] sm:$0xff] }
   0xd   :  { %236 = vmatpush.msra.mxu2 %v66_v20  ;;  %255 = vmatpush.msra.mxu3 %v83_v21  ;;  %v62_v36 = vld [vmem:[%s842_s1 + $0x130] sm:$0xff]  ;;  %v79_v37 = vld [vmem:[%s842_s1 + $0x1b8] sm:$0xff]  ;;  %v29_v39 = vld [vmem:[%s842_s1 + $0x28] sm:$0xff] }
   0xe   :  { %216 = vmatpush.msra.mxu1 %v50_v22  ;;  %197 = vmatpush.msra.mxu0 %v33_v23  ;;  %v46_v38 = vld [vmem:[%s842_s1 + $0xb0] sm:$0xff]  ;;  %v61_v40 = vld [vmem:[%s842_s1 + $0x128] sm:$0xff]  ;;  %v28_v43 = vld [vmem:[%s842_s1 + $0x20] sm:$0xff] }
   0xf   :  { %237 = vmatpush.msra.mxu2 %v65_v24  ;;  %256 = vmatpush.msra.mxu3 %v82_v25  ;;  %v78_v41 = vld [vmem:[%s842_s1 + $0x1b0] sm:$0xff]  ;;  %v45_v42 = vld [vmem:[%s842_s1 + $0xa8] sm:$0xff]  ;;  %v60_v44 = vld [vmem:[%s842_s1 + $0x120] sm:$0xff] }
  0x10   :  { %217 = vmatpush.msra.mxu1 %v49_v26  ;;  %198 = vmatpush.msra.mxu0 %v32_v27  ;;  %v77_v45 = vld [vmem:[%s842_s1 + $0x1a8] sm:$0xff]  ;;  %v44_v46 = vld [vmem:[%s842_s1 + $0xa0] sm:$0xff]  ;;  %v27_v47 = vld [vmem:[%s842_s1 + $0x18] sm:$0xff] }
  0x11   :  { %238 = vmatpush.msra.mxu2 %v64_v28  ;;  %257 = vmatpush.msra.mxu3 %v81_v29  ;;  %v59_v48 = vld [vmem:[%s842_s1 + $0x118] sm:$0xff]  ;;  %v76_v49 = vld [vmem:[%s842_s1 + $0x1a0] sm:$0xff]  ;;  %v26_v51 = vld [vmem:[%s842_s1 + $0x10] sm:$0xff] }
  0x12   :  { %218 = vmatpush.msra.mxu1 %v48_v30  ;;  %199 = vmatpush.msra.mxu0 %v31_v31  ;;  %v43_v50 = vld [vmem:[%s842_s1 + $0x98] sm:$0xff]  ;;  %v58_v52 = vld [vmem:[%s842_s1 + $0x110] sm:$0xff]  ;;  %v25_v55 = vld [vmem:[%s842_s1 + $0x8] sm:$0xff] }
  0x13   :  { %239 = vmatpush.msra.mxu2 %v63_v32  ;;  %258 = vmatpush.msra.mxu3 %v80_v33  ;;  %v75_v53 = vld [vmem:[%s842_s1 + $0x198] sm:$0xff]  ;;  %v42_v54 = vld [vmem:[%s842_s1 + $0x90] sm:$0xff]  ;;  %v57_v56 = vld [vmem:[%s842_s1 + $0x108] sm:$0xff] }
  0x14   :  { %219 = vmatpush.msra.mxu1 %v47_v34  ;;  %200 = vmatpush.msra.mxu0 %v30_v35  ;;  %v74_v57 = vld [vmem:[%s842_s1 + $0x190] sm:$0xff]  ;;  %v41_v58 = vld [vmem:[%s842_s1 + $0x88] sm:$0xff]  ;;  %v24_v59 = vld [vmem:[%s842_s1] sm:$0xff] }
  0x15   :  { %240 = vmatpush.msra.mxu2 %v62_v36  ;;  %259 = vmatpush.msra.mxu3 %v79_v37  ;;  %v56_v60 = vld [vmem:[%s842_s1 + $0x100] sm:$0xff]  ;;  %v73_v61 = vld [vmem:[%s842_s1 + $0x188] sm:$0xff]  ;;  %v103_v62 = vld [vmem:[%s842_s1 + $0x278] sm:$0xff] }
  0x16   :  { %220 = vmatpush.msra.mxu1 %v46_v38  ;;  %201 = vmatpush.msra.mxu0 %v29_v39  ;;  %v135_v63 = vld [vmem:[%s842_s1 + $0x378] sm:$0xff]  ;;  %v40_v0 = vld [vmem:[%s842_s1 + $0x80] sm:$0xff]  ;;  %v102_v2 = vld [vmem:[%s842_s1 + $0x270] sm:$0xff] }
  0x17   :  { %241 = vmatpush.msra.mxu2 %v61_v40  ;;  %260 = vmatpush.msra.mxu3 %v78_v41  ;;  %v72_v1 = vld [vmem:[%s842_s1 + $0x180] sm:$0xff]  ;;  %v119_v3 = vld [vmem:[%s842_s1 + $0x2f8] sm:$0xff]  ;;  %v134_v4 = vld [vmem:[%s842_s1 + $0x370] sm:$0xff] }
  0x18   :  { %221 = vmatpush.msra.mxu1 %v45_v42  ;;  %202 = vmatpush.msra.mxu0 %v28_v43  ;;  %v151_v5 = vld [vmem:[%s842_s1 + $0x3f8] sm:$0xff]  ;;  %v101_v6 = vld [vmem:[%s842_s1 + $0x268] sm:$0xff]  ;;  %v118_v7 = vld [vmem:[%s842_s1 + $0x2f0] sm:$0xff] }
  0x19   :  { %242 = vmatpush.msra.mxu2 %v60_v44  ;;  %261 = vmatpush.msra.mxu3 %v77_v45  ;;  %v133_v8 = vld [vmem:[%s842_s1 + $0x368] sm:$0xff]  ;;  %v150_v9 = vld [vmem:[%s842_s1 + $0x3f0] sm:$0xff]  ;;  %v100_v10 = vld [vmem:[%s842_s1 + $0x260] sm:$0xff] }
  0x1a   :  { %222 = vmatpush.msra.mxu1 %v44_v46  ;;  %203 = vmatpush.msra.mxu0 %v27_v47  ;;  %v117_v11 = vld [vmem:[%s842_s1 + $0x2e8] sm:$0xff]  ;;  %v132_v12 = vld [vmem:[%s842_s1 + $0x360] sm:$0xff]  ;;  %v18_v14 = vld [vmem:[%s841_s0 + $0x10] sm:$0xff] }
  0x1b   :  { %243 = vmatpush.msra.mxu2 %v59_v48  ;;  %262 = vmatpush.msra.mxu3 %v76_v49  ;;  %v16_v13 = vld [vmem:[%s841_s0] sm:$0xff]  ;;  %v22_v16 = vld [vmem:[%s841_s0 + $0x30] sm:$0xff]  ;;  %v149_v17 = vld [vmem:[%s842_s1 + $0x3e8] sm:$0xff]  ;;  %162 = vst [vmem:[#allocation1 + $0x1] ss:$4 sm:$0xff] %v18_v14 }
  0x1c   :  { %223 = vmatpush.msra.mxu1 %v43_v50  ;;  %204 = vmatpush.msra.mxu0 %v26_v51  ;;  %v20_v15 = vld [vmem:[%s841_s0 + $0x20] sm:$0xff]  ;;  %160 = vst [vmem:[#allocation1] ss:$4 sm:$0xff] %v16_v13  ;;  %v99_v18 = vld [vmem:[%s842_s1 + $0x258] sm:$0xff]  ;;  %v98_v22 = vld [vmem:[%s842_s1 + $0x250] sm:$0xff] }
  0x1d   :  { %244 = vmatpush.msra.mxu2 %v58_v52  ;;  %263 = vmatpush.msra.mxu3 %v75_v53  ;;  %v116_v19 = vld [vmem:[%s842_s1 + $0x2e0] sm:$0xff]  ;;  %v131_v20 = vld [vmem:[%s842_s1 + $0x358] sm:$0xff]  ;;  %164 = vst [vmem:[#allocation1 + $0x2] ss:$4 sm:$0xff] %v20_v15  ;;  %v130_v24 = vld [vmem:[%s842_s1 + $0x350] sm:$0xff] }
  0x1e   :  { %224 = vmatpush.msra.mxu1 %v42_v54  ;;  %205 = vmatpush.msra.mxu0 %v25_v55  ;;  %v148_v21 = vld [vmem:[%s842_s1 + $0x3e0] sm:$0xff]  ;;  %166 = vst [vmem:[#allocation1 + $0x3] ss:$4 sm:$0xff] %v22_v16  ;;  %v115_v23 = vld [vmem:[%s842_s1 + $0x2d8] sm:$0xff]  ;;  %v97_v26 = vld [vmem:[%s842_s1 + $0x248] sm:$0xff] }
  0x1f   :  { %245 = vmatpush.msra.mxu2 %v57_v56  ;;  %264 = vmatpush.msra.mxu3 %v74_v57  ;;  %v147_v25 = vld [vmem:[%s842_s1 + $0x3d8] sm:$0xff]  ;;  %v114_v27 = vld [vmem:[%s842_s1 + $0x2d0] sm:$0xff]  ;;  %v129_v28 = vld [vmem:[%s842_s1 + $0x348] sm:$0xff] }
  0x20   :  { %225 = vmatpush.msra.mxu1 %v41_v58  ;;  %206 = vmatpush.msra.mxu0 %v24_v59  ;;  %v146_v29 = vld [vmem:[%s842_s1 + $0x3d0] sm:$0xff]  ;;  %v96_v30 = vld [vmem:[%s842_s1 + $0x240] sm:$0xff]  ;;  %v113_v31 = vld [vmem:[%s842_s1 + $0x2c8] sm:$0xff] }
  0x21   :  { %246 = vmatpush.msra.mxu2 %v56_v60  ;;  %265 = vmatpush.msra.mxu3 %v73_v61  ;;  %v17_v32 = vld [vmem:[%s841_s0 + $0x8] sm:$0xff]  ;;  %v128_v33 = vld [vmem:[%s842_s1 + $0x340] sm:$0xff]  ;;  %v19_v35 = vld [vmem:[%s841_s0 + $0x18] sm:$0xff] }
  0x22   :  { %271 = vmatpush.msrb.mxu0 %v103_v62  ;;  %226 = vmatpush.msra.mxu1 %v40_v0  ;;  %v145_v34 = vld [vmem:[%s842_s1 + $0x3c8] sm:$0xff]  ;;  %168 = vst [vmem:[#allocation1 + $0x20] ss:$4 sm:$0xff] %v17_v32  ;;  %v95_v36 = vld [vmem:[%s842_s1 + $0x238] sm:$0xff]  ;;  %v112_v38 = vld [vmem:[%s842_s1 + $0x2c0] sm:$0xff] }
  0x23   :  { %311 = vmatpush.msrb.mxu2 %v135_v63  ;;  %266 = vmatpush.msra.mxu3 %v72_v1  ;;  %v21_v37 = vld [vmem:[%s841_s0 + $0x28] sm:$0xff]  ;;  %170 = vst [vmem:[#allocation1 + $0x21] ss:$4 sm:$0xff] %v19_v35  ;;  %v127_v39 = vld [vmem:[%s842_s1 + $0x338] sm:$0xff]  ;;  %v144_v41 = vld [vmem:[%s842_s1 + $0x3c0] sm:$0xff] }
  0x24   :  { %272 = vmatpush.msrb.mxu0 %v102_v2  ;;  %291 = vmatpush.msrb.mxu1 %v119_v3  ;;  %v23_v40 = vld [vmem:[%s841_s0 + $0x38] sm:$0xff]  ;;  %v94_v42 = vld [vmem:[%s842_s1 + $0x230] sm:$0xff]  ;;  %172 = vst [vmem:[#allocation1 + $0x22] ss:$4 sm:$0xff] %v21_v37  ;;  %v93_v46 = vld [vmem:[%s842_s1 + $0x228] sm:$0xff] }
  0x25   :  { %312 = vmatpush.msrb.mxu2 %v134_v4  ;;  %331 = vmatpush.msrb.mxu3 %v151_v5  ;;  %v111_v43 = vld [vmem:[%s842_s1 + $0x2b8] sm:$0xff]  ;;  %v126_v44 = vld [vmem:[%s842_s1 + $0x330] sm:$0xff]  ;;  %174 = vst [vmem:[#allocation1 + $0x23] ss:$4 sm:$0xff] %v23_v40  ;;  %v125_v48 = vld [vmem:[%s842_s1 + $0x328] sm:$0xff] }
  0x26   :  { %273 = vmatpush.msrb.mxu0 %v101_v6  ;;  %292 = vmatpush.msrb.mxu1 %v118_v7  ;;  %v143_v45 = vld [vmem:[%s842_s1 + $0x3b8] sm:$0xff]  ;;  %v110_v47 = vld [vmem:[%s842_s1 + $0x2b0] sm:$0xff]  ;;  %v92_v51 = vld [vmem:[%s842_s1 + $0x220] sm:$0xff] }
  0x27   :  { %313 = vmatpush.msrb.mxu2 %v133_v8  ;;  %332 = vmatpush.msrb.mxu3 %v150_v9  ;;  %v142_v49 = vld [vmem:[%s842_s1 + $0x3b0] sm:$0xff]  ;;  %v109_v52 = vld [vmem:[%s842_s1 + $0x2a8] sm:$0xff]  ;;  %v124_v53 = vld [vmem:[%s842_s1 + $0x320] sm:$0xff] }
  0x28   :  { %274 = vmatpush.msrb.mxu0 %v100_v10  ;;  %293 = vmatpush.msrb.mxu1 %v117_v11  ;;  %v177_v50 = vld.sshfl [vmem:[#allocation1 + $0x10] sm:$0xff pattern:$0x73625140]  ;;  %v141_v54 = vld [vmem:[%s842_s1 + $0x3a8] sm:$0xff]  ;;  %v91_v57 = vld [vmem:[%s842_s1 + $0x218] sm:$0xff] }
  0x29   :  { %314 = vmatpush.msrb.mxu2 %v132_v12  ;;  %333 = vmatpush.msrb.mxu3 %v149_v17  ;;  %v175_v55 = vld.sshfl [vmem:[#allocation1] sm:$0xff pattern:$0x73625140]  ;;  %v178_v56 = vld.sshfl [vmem:[#allocation1 + $0x18] sm:$0xff pattern:$0x73625140] }
  0x2a   :  { %275 = vmatpush.msrb.mxu0 %v99_v18  ;;  %294 = vmatpush.msrb.mxu1 %v116_v19  ;;  %v108_v58 = vld [vmem:[%s842_s1 + $0x2a0] sm:$0xff]  ;;  %v123_v59 = vld [vmem:[%s842_s1 + $0x318] sm:$0xff]  ;;  %v176_v61 = vld.sshfl [vmem:[#allocation1 + $0x8] sm:$0xff pattern:$0x73625140] }
  0x2b   :  { %315 = vmatpush.msrb.mxu2 %v131_v20  ;;  %334 = vmatpush.msrb.mxu3 %v148_v21  ;;  %v140_v60 = vld [vmem:[%s842_s1 + $0x3a0] sm:$0xff]  ;;  %v90_v62 = vld [vmem:[%s842_s1 + $0x210] sm:$0xff]  ;;  %v107_v63 = vld [vmem:[%s842_s1 + $0x298] sm:$0xff] }
  0x2c   :  { %276 = vmatpush.msrb.mxu0 %v98_v22  ;;  %295 = vmatpush.msrb.mxu1 %v115_v23  ;;  %v122_v0 = vld [vmem:[%s842_s1 + $0x310] sm:$0xff]  ;;  %v139_v1 = vld [vmem:[%s842_s1 + $0x398] sm:$0xff]  ;;  %v89_v2 = vld [vmem:[%s842_s1 + $0x208] sm:$0xff] }
  0x2d   :  { %316 = vmatpush.msrb.mxu2 %v130_v24  ;;  %335 = vmatpush.msrb.mxu3 %v147_v25  ;;  %v106_v3 = vld [vmem:[%s842_s1 + $0x290] sm:$0xff]  ;;  %v121_v4 = vld [vmem:[%s842_s1 + $0x308] sm:$0xff]  ;;  %v88_v6 = vld [vmem:[%s842_s1 + $0x200] sm:$0xff] }
  0x2e   :  { %277 = vmatpush.msrb.mxu0 %v97_v26  ;;  %296 = vmatpush.msrb.mxu1 %v114_v27  ;;  %v138_v5 = vld [vmem:[%s842_s1 + $0x390] sm:$0xff]  ;;  %v105_v7 = vld [vmem:[%s842_s1 + $0x288] sm:$0xff]  ;;  %v120_v8 = vld [vmem:[%s842_s1 + $0x300] sm:$0xff] }
  0x2f   :  { %317 = vmatpush.msrb.mxu2 %v129_v28  ;;  %336 = vmatpush.msrb.mxu3 %v146_v29  ;;  %v137_v9 = vld [vmem:[%s842_s1 + $0x388] sm:$0xff]  ;;  %v179_v10 = vld.sshfl [vmem:[#allocation1 + $0x20] sm:$0xff pattern:$0x73625140] }
  0x30   :  { %278 = vmatpush.msrb.mxu0 %v96_v30  ;;  %297 = vmatpush.msrb.mxu1 %v113_v31  ;;  %v181_v11 = vld.sshfl [vmem:[#allocation1 + $0x30] sm:$0xff pattern:$0x73625140]  ;;  %v104_v12 = vld [vmem:[%s842_s1 + $0x280] sm:$0xff] }
  0x31   :  { %318 = vmatpush.msrb.mxu2 %v128_v33  ;;  %337 = vmatpush.msrb.mxu3 %v145_v34  ;;  %v136_v13 = vld [vmem:[%s842_s1 + $0x380] sm:$0xff]  ;;  %v180_v14 = vld.sshfl [vmem:[#allocation1 + $0x28] sm:$0xff pattern:$0x73625140] }
  0x32   :  { %279 = vmatpush.msrb.mxu0 %v95_v36  ;;  %298 = vmatpush.msrb.mxu1 %v112_v38  ;;  %v182_v15 = vld.sshfl [vmem:[#allocation1 + $0x38] sm:$0xff pattern:$0x73625140]  ;;  %v377_v29 = vld [vmem:[%s843_s2] ss:$0 sm:$0xff] }
  0x33   :  { %319 = vmatpush.msrb.mxu2 %v127_v39  ;;  %338 = vmatpush.msrb.mxu3 %v144_v41 }
  0x34   :  { %280 = vmatpush.msrb.mxu0 %v94_v42  ;;  %299 = vmatpush.msrb.mxu1 %v111_v43 }
  0x35   :  { %320 = vmatpush.msrb.mxu2 %v126_v44  ;;  %339 = vmatpush.msrb.mxu3 %v143_v45 }
  0x36   :  { %281 = vmatpush.msrb.mxu0 %v93_v46  ;;  %300 = vmatpush.msrb.mxu1 %v110_v47 }
  0x37   :  { %321 = vmatpush.msrb.mxu2 %v125_v48  ;;  %340 = vmatpush.msrb.mxu3 %v142_v49 }
  0x38   :  { %247 = vmatmul.f32.vlgmr.msra.gmra.mxu2 %v177_v50  ;;  %282 = vmatpush.msrb.mxu0 %v92_v51 }
  0x39   :  { %301 = vmatpush.msrb.mxu1 %v109_v52  ;;  %322 = vmatpush.msrb.mxu2 %v124_v53 }
  0x3a   :  { %341 = vmatpush.msrb.mxu3 %v141_v54  ;;  %207 = vmatmul.f32.vlgmr.msra.gmra.mxu0 %v175_v55 }
  0x3b   :  { %267 = vmatmul.f32.vlgmr.msra.gmra.mxu3 %v178_v56  ;;  %283 = vmatpush.msrb.mxu0 %v91_v57 }
  0x3c   :  { %302 = vmatpush.msrb.mxu1 %v108_v58  ;;  %323 = vmatpush.msrb.mxu2 %v123_v59 }
  0x3d   :  { %342 = vmatpush.msrb.mxu3 %v140_v60  ;;  %227 = vmatmul.f32.vlgmr.msra.gmra.mxu1 %v176_v61 }
  0x3e   :  { %284 = vmatpush.msrb.mxu0 %v90_v62  ;;  %303 = vmatpush.msrb.mxu1 %v107_v63 }
  0x3f   :  { %324 = vmatpush.msrb.mxu2 %v122_v0  ;;  %343 = vmatpush.msrb.mxu3 %v139_v1 }
  0x40   :  { %285 = vmatpush.msrb.mxu0 %v89_v2  ;;  %304 = vmatpush.msrb.mxu1 %v106_v3 }
  0x41   :  { %325 = vmatpush.msrb.mxu2 %v121_v4  ;;  %344 = vmatpush.msrb.mxu3 %v138_v5 }
  0x42   :  { %286 = vmatpush.msrb.mxu0 %v88_v6  ;;  %305 = vmatpush.msrb.mxu1 %v105_v7 }
  0x43   :  { %326 = vmatpush.msrb.mxu2 %v120_v8  ;;  %345 = vmatpush.msrb.mxu3 %v137_v9 }
  0x44   :  { %287 = vmatmul.f32.vlgmr.msrb.gmra.mxu0 %v179_v10  ;;  %327 = vmatmul.f32.vlgmr.msrb.gmra.mxu2 %v181_v11 }
  0x45   :  { %306 = vmatpush.msrb.mxu1 %v104_v12  ;;  %346 = vmatpush.msrb.mxu3 %v136_v13 }
  0x46   :  { %307 = vmatmul.f32.vlgmr.msrb.gmra.mxu1 %v180_v14  ;;  %347 = vmatmul.f32.vlgmr.msrb.gmra.mxu3 %v182_v15 }
  0xb7   :  { %v208_v16 = vpop.f32.mrf.mxu0 }
  0xba   :  { %v228_v17 = vpop.f32.mrf.mxu1 }
  0xbb   :  { %v248_v18 = vpop.f32.mrf.mxu2  ;;  %v229_v19 = vadd.f32 %v228_v17, %v208_v16 }
  0xbd   :  { %v249_v20 = vadd.f32 %v248_v18, %v229_v19 }
  0xbe   :  { %v268_v21 = vpop.f32.mrf.mxu3 }
  0xbf   :  { %v269_v22 = vadd.f32 %v268_v21, %v249_v20 }
  0xc1   :  { %v288_v23 = vpop.f32.mrf.mxu0 }
  0xc2   :  { %v289_v24 = vadd.f32 %v288_v23, %v269_v22 }
  0xc3   :  { %v308_v25 = vpop.f32.mrf.mxu1 }
  0xc4   :  { %v309_v26 = vadd.f32 %v308_v25, %v289_v24 }
  0xc7   :  { %v328_v27 = vpop.f32.mrf.mxu2 }
  0xc8   :  { %v329_v28 = vadd.f32 %v328_v27, %v309_v26 }
  0xc9   :  { %v348_v30 = vpop.f32.mrf.mxu3 }
  0xca   :  { %v349_v31 = vadd.f32 %v348_v30, %v329_v28 }
  0xcc   :  { %v354_v32 = vadd.f32 %v377_v29, %v349_v31 }
  0xce   :  { %355 = vst [vmem:[#allocation2] sm:$0xff] %v354_v32 }
  0xcf   :  { %359 = vsyncadd [#allocation3], 96  ;;  %s362_s14 = sshll.u32 %s844_s3, 4  ;;  %s404_s15 = smov [#allocation2]   ;;  %s363_s14 = int_to_ptr.hbm [resolvable:$true] %s362_s14 }
  0xd0   :  { %s360_s16 = sshll.u32 %s404_s15, 4  ;;  %s405_s17 = smov 32   ;;  %s361_s16 = int_to_ptr.vmem [resolvable:$true] %s360_s16 }
  0xd1   :  { %s406_s18 = smov 2  }
  0xd2   :  { %368 = dma.vmem_to_hbm [thread:$0]  %s361_s16, 32, %s363_s14, [#allocation3], %s405_s17, %s405_s17, %s406_s18  }
  0xd3   :  { %402 = dma.done.wait [#allocation3], 128  }
  0xd4   :  { %403 = vsyncadd [#allocation3], 4294967168 }
  0xd5   :  { %373 = vsyncpa [#allocation3], 1 }

</bundles_post_ra>
